<compile_context>
chip_gen: v7x
topology: tpu7x:2x2x1
jax: 0.10.0
libtpu: 0.0.40
codegen_flags: <defaults>
</compile_context>

<pallas_src>
import functools

import jax
import jax.numpy as jnp
from jax.experimental import pallas as pl
from jax.experimental.pallas import tpu as pltpu

EPS = 1e-5          # BatchNorm2d default eps
NEG_SLOPE = 0.01    # nn.LeakyReLU() default negative_slope


def _conv_stats_kernel(x_ref, w_ref, mask_ref, conv_ref, sum_ref, ssq_ref, *,
                       kh_size, kw_size, img_w, hw, cout):
    """Per-image conv (tap-summed matmuls) + masked per-channel BN partial sums."""
    n = pl.program_id(0)
    x = x_ref[...]                                   # (C, H*W + pad)  bf16

    acc = jnp.zeros((cout, hw), jnp.float32)
    for kh in range(kh_size):
        for kw in range(kw_size):
            off = kh * img_w + kw                    # static shift for this tap
            tap = kh * kw_size + kw
            acc = acc + jnp.dot(w_ref[tap], x[:, off:off + hw],
                                preferred_element_type=jnp.float32)
    conv_ref[...] = acc                              # lane-dense (Cout, H*W) store

    @pl.when(n == 0)
    def _():
        sum_ref[...] = jnp.zeros_like(sum_ref)
        ssq_ref[...] = jnp.zeros_like(ssq_ref)

    msk = mask_ref[...]                              # (1, H*W): 1.0 at valid (oh, ow)
    cm = acc * msk
    sum_ref[...] = sum_ref[...] + jnp.sum(cm, axis=1, keepdims=True)
    ssq_ref[...] = ssq_ref[...] + jnp.sum(cm * acc, axis=1, keepdims=True)


def _bn_act_kernel(sum_ref, ssq_ref, g_ref, b_ref, conv_ref, o_ref, *,
                   m_valid, eps, neg_slope):
    """Fused BN (train-mode batch stats) scale/shift + LeakyReLU."""
    inv_m = 1.0 / m_valid
    mean = sum_ref[...] * inv_m                      # (Cout, 1)
    # E[x^2] - mean^2 (biased var), accumulated in f32; clamp tiny negatives.
    var = jnp.maximum(ssq_ref[...] * inv_m - mean * mean, 0.0)
    scale = g_ref[...] * jax.lax.rsqrt(var + eps)
    shift = b_ref[...] - mean * scale
    y = conv_ref[...] * scale + shift                # (Cout, H*W)
    o_ref[...] = jnp.where(y >= 0.0, y, neg_slope * y)


def conv_block(x, weight, bias, gamma, beta):
    """x: [N, C, H, W] (NCHW, like PyTorch). Returns [N, Cout, OH, OW]."""
    N, C, H, W = x.shape
    Cout, Cin, KH, KW = weight.shape
    assert Cin == C
    OH, OW = H - KH + 1, W - KW + 1                  # stride=1, pad=0
    HW = H * W
    PAD = (KH - 1) * W + (KW - 1)                    # max tap shift
    HWP = HW + PAD
    M = N * OH * OW                                  # valid output positions

    # Conv bias is unused: train-mode BatchNorm subtracts the per-channel mean,
    # so a constant per-channel bias cancels exactly in the forward output.
    del bias

    # bf16 MXU operands; flatten spatial dims + zero-pad (no im2col expansion).
    x3 = jnp.pad(x.reshape(N, C, HW).astype(jnp.bfloat16),
                 ((0, 0), (0, 0), (0, PAD)))
    # Per-tap weight slices: w_taps[kh*KW + kw] = weight[:, :, kh, kw]  -> (Cout, C)
    w_taps = weight.transpose(2, 3, 0, 1).reshape(KH * KW, Cout, C).astype(jnp.bfloat16)
    # Valid-position mask over one image's flattened H*W grid.
    mask = ((jnp.arange(H) < OH)[:, None] & (jnp.arange(W) < OW)[None, :])
    mask = mask.reshape(1, HW).astype(jnp.float32)
    g2 = gamma.reshape(Cout, 1).astype(jnp.float32)
    b2 = beta.reshape(Cout, 1).astype(jnp.float32)

    # ---- phase 1: conv tiles + global BN statistics (reduction over batch) ----
    k1 = functools.partial(_conv_stats_kernel, kh_size=KH, kw_size=KW,
                           img_w=W, hw=HW, cout=Cout)
    conv, csum, cssq = pl.pallas_call(
        k1,
        grid=(N,),
        in_specs=[
            pl.BlockSpec((None, C, HWP), lambda n: (n, 0, 0)),      # one image of x
            pl.BlockSpec((KH * KW, Cout, C), lambda n: (0, 0, 0)),  # tap weights
            pl.BlockSpec((1, HW), lambda n: (0, 0)),                # valid mask
        ],
        out_specs=[
            pl.BlockSpec((None, Cout, HW), lambda n: (n, 0, 0)),    # conv (lane-dense)
            pl.BlockSpec((Cout, 1), lambda n: (0, 0)),              # sum   (accumulator)
            pl.BlockSpec((Cout, 1), lambda n: (0, 0)),              # sumsq (accumulator)
        ],
        out_shape=(
            jax.ShapeDtypeStruct((N, Cout, HW), jnp.float32),
            jax.ShapeDtypeStruct((Cout, 1), jnp.float32),
            jax.ShapeDtypeStruct((Cout, 1), jnp.float32),
        ),
        compiler_params=pltpu.CompilerParams(
            dimension_semantics=("arbitrary",)),   # stats accumulate across batch
    )(x3, w_taps, mask)

    # ---- phase 2: fused normalize + LeakyReLU, independent per image ----
    k2 = functools.partial(_bn_act_kernel, m_valid=float(M), eps=EPS,
                           neg_slope=NEG_SLOPE)
    out_flat = pl.pallas_call(
        k2,
        grid=(N,),
        in_specs=[
            pl.BlockSpec((Cout, 1), lambda n: (0, 0)),              # sum
            pl.BlockSpec((Cout, 1), lambda n: (0, 0)),              # sumsq
            pl.BlockSpec((Cout, 1), lambda n: (0, 0)),              # gamma
            pl.BlockSpec((Cout, 1), lambda n: (0, 0)),              # beta
            pl.BlockSpec((None, Cout, HW), lambda n: (n, 0, 0)),    # conv
        ],
        out_specs=pl.BlockSpec((None, Cout, HW), lambda n: (n, 0, 0)),
        out_shape=jax.ShapeDtypeStruct((N, Cout, HW), jnp.float32),
        compiler_params=pltpu.CompilerParams(
            dimension_semantics=("parallel",)),    # megacore / v7x 2-TC sharding
    )(csum, cssq, g2, b2, conv)

    # Crop invalid right/bottom edge; already in N, Cout order -> no transpose.
    return out_flat.reshape(N, Cout, H, W)[:, :, :OH, :OW]


def reference(x, weight, bias, gamma, beta):
    """Pure-JAX reference (conv + train-mode BN + LeakyReLU).  Conv operands are
    rounded to bf16 to mirror the kernel's MXU input precision (f32 accumulate)."""
    xb = x.astype(jnp.bfloat16).astype(jnp.float32)
    wb = weight.astype(jnp.bfloat16).astype(jnp.float32)
    conv = jax.lax.conv_general_dilated(
        xb, wb, window_strides=(1, 1), padding="VALID",
        dimension_numbers=("NCHW", "OIHW", "NCHW"),
        precision=jax.lax.Precision.HIGHEST)
    conv = conv + bias.reshape(1, -1, 1, 1)          # cancelled by BN, kept for rigor
    mean = jnp.mean(conv, axis=(0, 2, 3), keepdims=True)
    var = jnp.mean((conv - mean) ** 2, axis=(0, 2, 3), keepdims=True)
    y = (conv - mean) * jax.lax.rsqrt(var + EPS)
    y = y * gamma.reshape(1, -1, 1, 1) + beta.reshape(1, -1, 1, 1)
    return jnp.where(y >= 0, y, NEG_SLOPE * y)


if __name__ == "__main__":
    # Small shapes consistent with the module: batch=2, in_chan=4, out_chan=8,
    # spatial 16x16, ksize=3, stride=1, pad=0 -> output 14x14.
    N, Cin, H, W = 2, 4, 16, 16
    Cout, KH, KW = 8, 3, 3

    key = jax.random.PRNGKey(0)
    kx, kw_, kb = jax.random.split(key, 3)
    x = jax.random.normal(kx, (N, Cin, H, W), dtype=jnp.float32)

    fan_in = Cin * KH * KW
    bound = 1.0 / float(fan_in) ** 0.5
    weight = jax.random.uniform(kw_, (Cout, Cin, KH, KW), jnp.float32, -bound, bound)
    bias = jax.random.uniform(kb, (Cout,), jnp.float32, -bound, bound)
    gamma = jnp.ones((Cout,), jnp.float32)   # BatchNorm2d default weight
    beta = jnp.zeros((Cout,), jnp.float32)   # BatchNorm2d default bias

    out = jax.jit(conv_block)(x, weight, bias, gamma, beta)
    out = jax.block_until_ready(out)

    ref = reference(x, weight, bias, gamma, beta)
    assert out.shape == (N, Cout, H - KH + 1, W - KW + 1)
    assert jnp.allclose(out, ref, atol=5e-4, rtol=5e-4), "mismatch vs reference"

    print("KERNEL_OK")
</pallas_src>

<mosaic_0001>
module attributes {stable_mosaic.version = 11 : i64} {
  func.func @_bn_act_kernel(%arg0: i32, %arg1: memref<8x1xf32, #tpu.memory_space<vmem>>, %arg2: memref<8x1xf32, #tpu.memory_space<vmem>>, %arg3: memref<8x1xf32, #tpu.memory_space<vmem>>, %arg4: memref<8x1xf32, #tpu.memory_space<vmem>>, %arg5: memref<1x8x256xf32, #tpu.memory_space<vmem>>, %arg6: memref<1x8x256xf32, #tpu.memory_space<vmem>>) attributes {dimension_semantics = [#tpu.dimension_semantics<parallel>], iteration_bounds = array<i64: 2>, scalar_prefetch = 0 : i64, scratch_operands = 0 : i64, tpu.core_type = #tpu.core_type<tc>, window_params = [{pipeline_mode = #tpu.pipeline_mode<synchronous>, transform_indices = @transform_0, window_bounds = array<i64: 8, 1>}, {pipeline_mode = #tpu.pipeline_mode<synchronous>, transform_indices = @transform_1, window_bounds = array<i64: 8, 1>}, {pipeline_mode = #tpu.pipeline_mode<synchronous>, transform_indices = @transform_2, window_bounds = array<i64: 8, 1>}, {pipeline_mode = #tpu.pipeline_mode<synchronous>, transform_indices = @transform_3, window_bounds = array<i64: 8, 1>}, {transform_indices = @transform_4, window_bounds = array<i64: 1, 8, 256>}, {transform_indices = @transform_5, window_bounds = array<i64: 1, 8, 256>}]} {
    %c0 = arith.constant 0 : index
    %c0_0 = arith.constant 0 : index
    %0 = vector.load %arg1[%c0, %c0_0] : memref<8x1xf32, #tpu.memory_space<vmem>>, vector<8x1xf32>
    %cst = arith.constant 0.00255102036 : f32
    %1 = vector.broadcast %cst : f32 to vector<8x1xf32>
    %2 = arith.mulf %0, %1 : vector<8x1xf32>
    %c0_1 = arith.constant 0 : index
    %c0_2 = arith.constant 0 : index
    %3 = vector.load %arg2[%c0_1, %c0_2] : memref<8x1xf32, #tpu.memory_space<vmem>>, vector<8x1xf32>
    %cst_3 = arith.constant 0.00255102036 : f32
    %4 = vector.broadcast %cst_3 : f32 to vector<8x1xf32>
    %5 = arith.mulf %3, %4 : vector<8x1xf32>
    %6 = arith.mulf %2, %2 : vector<8x1xf32>
    %7 = arith.subf %5, %6 : vector<8x1xf32>
    %cst_4 = arith.constant 0.000000e+00 : f32
    %8 = vector.broadcast %cst_4 : f32 to vector<8x1xf32>
    %9 = arith.maximumf %7, %8 : vector<8x1xf32>
    %c0_5 = arith.constant 0 : index
    %c0_6 = arith.constant 0 : index
    %10 = vector.load %arg3[%c0_5, %c0_6] : memref<8x1xf32, #tpu.memory_space<vmem>>, vector<8x1xf32>
    %cst_7 = arith.constant 9.99999974E-6 : f32
    %11 = vector.broadcast %cst_7 : f32 to vector<8x1xf32>
    %12 = arith.addf %9, %11 : vector<8x1xf32>
    %13 = math.rsqrt %12 : vector<8x1xf32>
    %14 = arith.mulf %10, %13 : vector<8x1xf32>
    %c0_8 = arith.constant 0 : index
    %c0_9 = arith.constant 0 : index
    %15 = vector.load %arg4[%c0_8, %c0_9] : memref<8x1xf32, #tpu.memory_space<vmem>>, vector<8x1xf32>
    %16 = arith.mulf %2, %14 : vector<8x1xf32>
    %17 = arith.subf %15, %16 : vector<8x1xf32>
    %c0_10 = arith.constant 0 : index
    %c0_11 = arith.constant 0 : index
    %c0_12 = arith.constant 0 : index
    %18 = vector.load %arg5[%c0_10, %c0_11, %c0_12] : memref<1x8x256xf32, #tpu.memory_space<vmem>>, vector<1x8x256xf32>
    %19 = vector.shape_cast %18 : vector<1x8x256xf32> to vector<8x256xf32>
    %20 = vector.broadcast %14 : vector<8x1xf32> to vector<8x256xf32>
    %21 = arith.mulf %19, %20 : vector<8x256xf32>
    %22 = vector.broadcast %17 : vector<8x1xf32> to vector<8x256xf32>
    %23 = arith.addf %21, %22 : vector<8x256xf32>
    %cst_13 = arith.constant 0.000000e+00 : f32
    %24 = vector.broadcast %cst_13 : f32 to vector<8x256xf32>
    %25 = arith.cmpf oge, %23, %24 : vector<8x256xf32>
    %cst_14 = arith.constant 0.00999999977 : f32
    %26 = vector.broadcast %cst_14 : f32 to vector<8x256xf32>
    %27 = arith.mulf %26, %23 : vector<8x256xf32>
    %28 = arith.select %25, %23, %27 : vector<8x256xi1>, vector<8x256xf32>
    %c0_15 = arith.constant 0 : index
    %c0_16 = arith.constant 0 : index
    %c0_17 = arith.constant 0 : index
    %29 = vector.load %arg6[%c0_15, %c0_16, %c0_17] : memref<1x8x256xf32, #tpu.memory_space<vmem>>, vector<1x8x256xf32>
    %30 = vector.shape_cast %29 : vector<1x8x256xf32> to vector<8x256xf32>
    %31 = vector.shape_cast %28 : vector<8x256xf32> to vector<1x8x256xf32>
    tpu.vector_store %arg6[%c0_15, %c0_16, %c0_17], %31 {strides = array<i32>} : memref<1x8x256xf32, #tpu.memory_space<vmem>>, vector<1x8x256xf32>,
    return
  }
  func.func @transform_0(%arg0: i32) -> (i32, i32) {
    %c0_i32 = arith.constant 0 : i32
    %c0_i32_0 = arith.constant 0 : i32
    %c0_i32_1 = arith.constant 0 : i32
    return %c0_i32, %c0_i32_0 : i32, i32
  }
  func.func @transform_1(%arg0: i32) -> (i32, i32) {
    %c0_i32 = arith.constant 0 : i32
    %c0_i32_0 = arith.constant 0 : i32
    %c0_i32_1 = arith.constant 0 : i32
    return %c0_i32, %c0_i32_0 : i32, i32
  }
  func.func @transform_2(%arg0: i32) -> (i32, i32) {
    %c0_i32 = arith.constant 0 : i32
    %c0_i32_0 = arith.constant 0 : i32
    %c0_i32_1 = arith.constant 0 : i32
    return %c0_i32, %c0_i32_0 : i32, i32
  }
  func.func @transform_3(%arg0: i32) -> (i32, i32) {
    %c0_i32 = arith.constant 0 : i32
    %c0_i32_0 = arith.constant 0 : i32
    %c0_i32_1 = arith.constant 0 : i32
    return %c0_i32, %c0_i32_0 : i32, i32
  }
  func.func @transform_4(%arg0: i32) -> (i32, i32, i32) {
    %c0_i32 = arith.constant 0 : i32
    %c0_i32_0 = arith.constant 0 : i32
    %c0_i32_1 = arith.constant 0 : i32
    return %arg0, %c0_i32, %c0_i32_0 : i32, i32, i32
  }
  func.func @transform_5(%arg0: i32) -> (i32, i32, i32) {
    %c0_i32 = arith.constant 0 : i32
    %c0_i32_0 = arith.constant 0 : i32
    %c0_i32_1 = arith.constant 0 : i32
    return %arg0, %c0_i32, %c0_i32_0 : i32, i32, i32
  }
}

module attributes {stable_mosaic.version = 11 : i64} {
  func.func @_conv_stats_kernel(%arg0: i32, %arg1: memref<1x4x290xbf16, #tpu.memory_space<vmem>>, %arg2: memref<9x8x4xbf16, #tpu.memory_space<vmem>>, %arg3: memref<1x256xf32, #tpu.memory_space<vmem>>, %arg4: memref<1x8x256xf32, #tpu.memory_space<vmem>>, %arg5: memref<8x1xf32, #tpu.memory_space<vmem>>, %arg6: memref<8x1xf32, #tpu.memory_space<vmem>>) attributes {dimension_semantics = [#tpu.dimension_semantics<arbitrary>], iteration_bounds = array<i64: 2>, scalar_prefetch = 0 : i64, scratch_operands = 0 : i64, tpu.core_type = #tpu.core_type<tc>, window_params = [{transform_indices = @transform_0, window_bounds = array<i64: 1, 4, 290>}, {pipeline_mode = #tpu.pipeline_mode<synchronous>, transform_indices = @transform_1, window_bounds = array<i64: 9, 8, 4>}, {pipeline_mode = #tpu.pipeline_mode<synchronous>, transform_indices = @transform_2, window_bounds = array<i64: 1, 256>}, {transform_indices = @transform_3, window_bounds = array<i64: 1, 8, 256>}, {pipeline_mode = #tpu.pipeline_mode<synchronous>, transform_indices = @transform_4, window_bounds = array<i64: 8, 1>}, {pipeline_mode = #tpu.pipeline_mode<synchronous>, transform_indices = @transform_5, window_bounds = array<i64: 8, 1>}]} {
    %c0 = arith.constant 0 : index
    %c0_0 = arith.constant 0 : index
    %c0_1 = arith.constant 0 : index
    %0 = vector.load %arg1[%c0, %c0_0, %c0_1] : memref<1x4x290xbf16, #tpu.memory_space<vmem>>, vector<1x4x290xbf16>
    %1 = vector.shape_cast %0 : vector<1x4x290xbf16> to vector<4x290xbf16>
    %cst = arith.constant 0.000000e+00 : f32
    %2 = vector.broadcast %cst : f32 to vector<8x256xf32>
    %c0_2 = arith.constant 0 : index
    %c0_3 = arith.constant 0 : index
    %c0_4 = arith.constant 0 : index
    %3 = vector.load %arg2[%c0_2, %c0_3, %c0_4] : memref<9x8x4xbf16, #tpu.memory_space<vmem>>, vector<1x8x4xbf16>
    %4 = vector.shape_cast %3 : vector<1x8x4xbf16> to vector<8x4xbf16>
    %5 = vector.extract_strided_slice %1 {offsets = [0, 0], sizes = [4, 256], strides = [1, 1]} : vector<4x290xbf16> to vector<4x256xbf16>
    %cst_5 = arith.constant dense<0.000000e+00> : vector<8x256xf32>
    %6 = tpu.matmul %4, %5, %cst_5 {dimension_numbers = #tpu.dot_dimension_numbers<[1], [0], [0], [1], [0, 0, 1, 1], [], []>} : vector<8x4xbf16>, vector<4x256xbf16>, vector<8x256xf32> -> vector<8x256xf32>
    %7 = arith.addf %2, %6 : vector<8x256xf32>
    %c1 = arith.constant 1 : index
    %c0_6 = arith.constant 0 : index
    %c0_7 = arith.constant 0 : index
    %8 = vector.load %arg2[%c1, %c0_6, %c0_7] : memref<9x8x4xbf16, #tpu.memory_space<vmem>>, vector<1x8x4xbf16>
    %9 = vector.shape_cast %8 : vector<1x8x4xbf16> to vector<8x4xbf16>
    %10 = vector.extract_strided_slice %1 {offsets = [0, 1], sizes = [4, 256], strides = [1, 1]} : vector<4x290xbf16> to vector<4x256xbf16>
    %cst_8 = arith.constant dense<0.000000e+00> : vector<8x256xf32>
    %11 = tpu.matmul %9, %10, %cst_8 {dimension_numbers = #tpu.dot_dimension_numbers<[1], [0], [0], [1], [0, 0, 1, 1], [], []>} : vector<8x4xbf16>, vector<4x256xbf16>, vector<8x256xf32> -> vector<8x256xf32>
    %12 = arith.addf %7, %11 : vector<8x256xf32>
    %c2 = arith.constant 2 : index
    %c0_9 = arith.constant 0 : index
    %c0_10 = arith.constant 0 : index
    %13 = vector.load %arg2[%c2, %c0_9, %c0_10] : memref<9x8x4xbf16, #tpu.memory_space<vmem>>, vector<1x8x4xbf16>
    %14 = vector.shape_cast %13 : vector<1x8x4xbf16> to vector<8x4xbf16>
    %15 = vector.extract_strided_slice %1 {offsets = [0, 2], sizes = [4, 256], strides = [1, 1]} : vector<4x290xbf16> to vector<4x256xbf16>
    %cst_11 = arith.constant dense<0.000000e+00> : vector<8x256xf32>
    %16 = tpu.matmul %14, %15, %cst_11 {dimension_numbers = #tpu.dot_dimension_numbers<[1], [0], [0], [1], [0, 0, 1, 1], [], []>} : vector<8x4xbf16>, vector<4x256xbf16>, vector<8x256xf32> -> vector<8x256xf32>
    %17 = arith.addf %12, %16 : vector<8x256xf32>
    %c3 = arith.constant 3 : index
    %c0_12 = arith.constant 0 : index
    %c0_13 = arith.constant 0 : index
    %18 = vector.load %arg2[%c3, %c0_12, %c0_13] : memref<9x8x4xbf16, #tpu.memory_space<vmem>>, vector<1x8x4xbf16>
    %19 = vector.shape_cast %18 : vector<1x8x4xbf16> to vector<8x4xbf16>
    %20 = vector.extract_strided_slice %1 {offsets = [0, 16], sizes = [4, 256], strides = [1, 1]} : vector<4x290xbf16> to vector<4x256xbf16>
    %cst_14 = arith.constant dense<0.000000e+00> : vector<8x256xf32>
    %21 = tpu.matmul %19, %20, %cst_14 {dimension_numbers = #tpu.dot_dimension_numbers<[1], [0], [0], [1], [0, 0, 1, 1], [], []>} : vector<8x4xbf16>, vector<4x256xbf16>, vector<8x256xf32> -> vector<8x256xf32>
    %22 = arith.addf %17, %21 : vector<8x256xf32>
    %c4 = arith.constant 4 : index
    %c0_15 = arith.constant 0 : index
    %c0_16 = arith.constant 0 : index
    %23 = vector.load %arg2[%c4, %c0_15, %c0_16] : memref<9x8x4xbf16, #tpu.memory_space<vmem>>, vector<1x8x4xbf16>
    %24 = vector.shape_cast %23 : vector<1x8x4xbf16> to vector<8x4xbf16>
    %25 = vector.extract_strided_slice %1 {offsets = [0, 17], sizes = [4, 256], strides = [1, 1]} : vector<4x290xbf16> to vector<4x256xbf16>
    %cst_17 = arith.constant dense<0.000000e+00> : vector<8x256xf32>
    %26 = tpu.matmul %24, %25, %cst_17 {dimension_numbers = #tpu.dot_dimension_numbers<[1], [0], [0], [1], [0, 0, 1, 1], [], []>} : vector<8x4xbf16>, vector<4x256xbf16>, vector<8x256xf32> -> vector<8x256xf32>
    %27 = arith.addf %22, %26 : vector<8x256xf32>
    %c5 = arith.constant 5 : index
    %c0_18 = arith.constant 0 : index
    %c0_19 = arith.constant 0 : index
    %28 = vector.load %arg2[%c5, %c0_18, %c0_19] : memref<9x8x4xbf16, #tpu.memory_space<vmem>>, vector<1x8x4xbf16>
    %29 = vector.shape_cast %28 : vector<1x8x4xbf16> to vector<8x4xbf16>
    %30 = vector.extract_strided_slice %1 {offsets = [0, 18], sizes = [4, 256], strides = [1, 1]} : vector<4x290xbf16> to vector<4x256xbf16>
    %cst_20 = arith.constant dense<0.000000e+00> : vector<8x256xf32>
    %31 = tpu.matmul %29, %30, %cst_20 {dimension_numbers = #tpu.dot_dimension_numbers<[1], [0], [0], [1], [0, 0, 1, 1], [], []>} : vector<8x4xbf16>, vector<4x256xbf16>, vector<8x256xf32> -> vector<8x256xf32>
    %32 = arith.addf %27, %31 : vector<8x256xf32>
    %c6 = arith.constant 6 : index
    %c0_21 = arith.constant 0 : index
    %c0_22 = arith.constant 0 : index
    %33 = vector.load %arg2[%c6, %c0_21, %c0_22] : memref<9x8x4xbf16, #tpu.memory_space<vmem>>, vector<1x8x4xbf16>
    %34 = vector.shape_cast %33 : vector<1x8x4xbf16> to vector<8x4xbf16>
    %35 = vector.extract_strided_slice %1 {offsets = [0, 32], sizes = [4, 256], strides = [1, 1]} : vector<4x290xbf16> to vector<4x256xbf16>
    %cst_23 = arith.constant dense<0.000000e+00> : vector<8x256xf32>
    %36 = tpu.matmul %34, %35, %cst_23 {dimension_numbers = #tpu.dot_dimension_numbers<[1], [0], [0], [1], [0, 0, 1, 1], [], []>} : vector<8x4xbf16>, vector<4x256xbf16>, vector<8x256xf32> -> vector<8x256xf32>
    %37 = arith.addf %32, %36 : vector<8x256xf32>
    %c7 = arith.constant 7 : index
    %c0_24 = arith.constant 0 : index
    %c0_25 = arith.constant 0 : index
    %38 = vector.load %arg2[%c7, %c0_24, %c0_25] : memref<9x8x4xbf16, #tpu.memory_space<vmem>>, vector<1x8x4xbf16>
    %39 = vector.shape_cast %38 : vector<1x8x4xbf16> to vector<8x4xbf16>
    %40 = vector.extract_strided_slice %1 {offsets = [0, 33], sizes = [4, 256], strides = [1, 1]} : vector<4x290xbf16> to vector<4x256xbf16>
    %cst_26 = arith.constant dense<0.000000e+00> : vector<8x256xf32>
    %41 = tpu.matmul %39, %40, %cst_26 {dimension_numbers = #tpu.dot_dimension_numbers<[1], [0], [0], [1], [0, 0, 1, 1], [], []>} : vector<8x4xbf16>, vector<4x256xbf16>, vector<8x256xf32> -> vector<8x256xf32>
    %42 = arith.addf %37, %41 : vector<8x256xf32>
    %c8 = arith.constant 8 : index
    %c0_27 = arith.constant 0 : index
    %c0_28 = arith.constant 0 : index
    %43 = vector.load %arg2[%c8, %c0_27, %c0_28] : memref<9x8x4xbf16, #tpu.memory_space<vmem>>, vector<1x8x4xbf16>
    %44 = vector.shape_cast %43 : vector<1x8x4xbf16> to vector<8x4xbf16>
    %45 = vector.extract_strided_slice %1 {offsets = [0, 34], sizes = [4, 256], strides = [1, 1]} : vector<4x290xbf16> to vector<4x256xbf16>
    %cst_29 = arith.constant dense<0.000000e+00> : vector<8x256xf32>
    %46 = tpu.matmul %44, %45, %cst_29 {dimension_numbers = #tpu.dot_dimension_numbers<[1], [0], [0], [1], [0, 0, 1, 1], [], []>} : vector<8x4xbf16>, vector<4x256xbf16>, vector<8x256xf32> -> vector<8x256xf32>
    %47 = arith.addf %42, %46 : vector<8x256xf32>
    %c0_30 = arith.constant 0 : index
    %c0_31 = arith.constant 0 : index
    %c0_32 = arith.constant 0 : index
    %48 = vector.load %arg4[%c0_30, %c0_31, %c0_32] : memref<1x8x256xf32, #tpu.memory_space<vmem>>, vector<1x8x256xf32>
    %49 = vector.shape_cast %48 : vector<1x8x256xf32> to vector<8x256xf32>
    %50 = vector.shape_cast %47 : vector<8x256xf32> to vector<1x8x256xf32>
    tpu.vector_store %arg4[%c0_30, %c0_31, %c0_32], %50 {strides = array<i32>} : memref<1x8x256xf32, #tpu.memory_space<vmem>>, vector<1x8x256xf32>,
    %c0_i32 = arith.constant 0 : i32
    %51 = arith.cmpi eq, %arg0, %c0_i32 : i32
    %52 = arith.extui %51 : i1 to i32
    %c0_i32_33 = arith.constant 0 : i32
    %53 = arith.cmpi ne, %52, %c0_i32_33 : i32
    scf.if %53 {
      %cst_46 = arith.constant 0.000000e+00 : f32
      %68 = vector.broadcast %cst_46 : f32 to vector<8x1xf32>
      %c0_47 = arith.constant 0 : index
      %c0_48 = arith.constant 0 : index
      %69 = vector.load %arg5[%c0_47, %c0_48] : memref<8x1xf32, #tpu.memory_space<vmem>>, vector<8x1xf32>
      tpu.vector_store %arg5[%c0_47, %c0_48], %68 {strides = array<i32>} : memref<8x1xf32, #tpu.memory_space<vmem>>, vector<8x1xf32>,
      %cst_49 = arith.constant 0.000000e+00 : f32
      %70 = vector.broadcast %cst_49 : f32 to vector<8x1xf32>
      %c0_50 = arith.constant 0 : index
      %c0_51 = arith.constant 0 : index
      %71 = vector.load %arg6[%c0_50, %c0_51] : memref<8x1xf32, #tpu.memory_space<vmem>>, vector<8x1xf32>
      tpu.vector_store %arg6[%c0_50, %c0_51], %70 {strides = array<i32>} : memref<8x1xf32, #tpu.memory_space<vmem>>, vector<8x1xf32>,
    } else {
    }
    %c0_34 = arith.constant 0 : index
    %c0_35 = arith.constant 0 : index
    %54 = vector.load %arg3[%c0_34, %c0_35] : memref<1x256xf32, #tpu.memory_space<vmem>>, vector<1x256xf32>
    %55 = vector.broadcast %54 : vector<1x256xf32> to vector<8x256xf32>
    %56 = arith.mulf %47, %55 : vector<8x256xf32>
    %c0_36 = arith.constant 0 : index
    %c0_37 = arith.constant 0 : index
    %57 = vector.load %arg5[%c0_36, %c0_37] : memref<8x1xf32, #tpu.memory_space<vmem>>, vector<8x1xf32>
    %cst_38 = arith.constant dense<0.000000e+00> : vector<8xf32>
    %58 = vector.multi_reduction <add>, %56, %cst_38 [1] : vector<8x256xf32> to vector<8xf32>
    %59 = vector.shape_cast %58 : vector<8xf32> to vector<8x1xf32>
    %60 = arith.addf %57, %59 : vector<8x1xf32>
    %c0_39 = arith.constant 0 : index
    %c0_40 = arith.constant 0 : index
    %61 = vector.load %arg5[%c0_39, %c0_40] : memref<8x1xf32, #tpu.memory_space<vmem>>, vector<8x1xf32>
    tpu.vector_store %arg5[%c0_39, %c0_40], %60 {strides = array<i32>} : memref<8x1xf32, #tpu.memory_space<vmem>>, vector<8x1xf32>,
    %c0_41 = arith.constant 0 : index
    %c0_42 = arith.constant 0 : index
    %62 = vector.load %arg6[%c0_41, %c0_42] : memref<8x1xf32, #tpu.memory_space<vmem>>, vector<8x1xf32>
    %63 = arith.mulf %56, %47 : vector<8x256xf32>
    %cst_43 = arith.constant dense<0.000000e+00> : vector<8xf32>
    %64 = vector.multi_reduction <add>, %63, %cst_43 [1] : vector<8x256xf32> to vector<8xf32>
    %65 = vector.shape_cast %64 : vector<8xf32> to vector<8x1xf32>
    %66 = arith.addf %62, %65 : vector<8x1xf32>
    %c0_44 = arith.constant 0 : index
    %c0_45 = arith.constant 0 : index
    %67 = vector.load %arg6[%c0_44, %c0_45] : memref<8x1xf32, #tpu.memory_space<vmem>>, vector<8x1xf32>
    tpu.vector_store %arg6[%c0_44, %c0_45], %66 {strides = array<i32>} : memref<8x1xf32, #tpu.memory_space<vmem>>, vector<8x1xf32>,
    return
  }
  func.func @transform_0(%arg0: i32) -> (i32, i32, i32) {
    %c0_i32 = arith.constant 0 : i32
    %c0_i32_0 = arith.constant 0 : i32
    %c0_i32_1 = arith.constant 0 : i32
    return %arg0, %c0_i32, %c0_i32_0 : i32, i32, i32
  }
  func.func @transform_1(%arg0: i32) -> (i32, i32, i32) {
    %c0_i32 = arith.constant 0 : i32
    %c0_i32_0 = arith.constant 0 : i32
    %c0_i32_1 = arith.constant 0 : i32
    %c0_i32_2 = arith.constant 0 : i32
    return %c0_i32, %c0_i32_0, %c0_i32_1 : i32, i32, i32
  }
  func.func @transform_2(%arg0: i32) -> (i32, i32) {
    %c0_i32 = arith.constant 0 : i32
    %c0_i32_0 = arith.constant 0 : i32
    %c0_i32_1 = arith.constant 0 : i32
    return %c0_i32, %c0_i32_0 : i32, i32
  }
  func.func @transform_3(%arg0: i32) -> (i32, i32, i32) {
    %c0_i32 = arith.constant 0 : i32
    %c0_i32_0 = arith.constant 0 : i32
    %c0_i32_1 = arith.constant 0 : i32
    return %arg0, %c0_i32, %c0_i32_0 : i32, i32, i32
  }
  func.func @transform_4(%arg0: i32) -> (i32, i32) {
    %c0_i32 = arith.constant 0 : i32
    %c0_i32_0 = arith.constant 0 : i32
    %c0_i32_1 = arith.constant 0 : i32
    return %c0_i32, %c0_i32_0 : i32, i32
  }
  func.func @transform_5(%arg0: i32) -> (i32, i32) {
    %c0_i32 = arith.constant 0 : i32
    %c0_i32_0 = arith.constant 0 : i32
    %c0_i32_1 = arith.constant 0 : i32
    return %c0_i32, %c0_i32_0 : i32, i32
  }
}

</mosaic_0001>

<bundles_post_ra>
// kernel: conv_block.3
= control target key start
LH: loop header
LB: loop body
LE: loop exit
PB: predicated region body
PF: predicated region fallthrough
CT: control target
= control target key end

     0   :  { %s382_s18 = smov 0   ;;  %s411_s0 = inlined_call_operand.vmem [shape: f32[8,1], index: 0, kind: input, shape index: {}]   ;;  %s412_s1 = inlined_call_operand.vmem [shape: f32[8,1], index: 1, kind: input, shape index: {}]   ;;  %s413_s2 = inlined_call_operand.vmem [shape: f32[8,1], index: 2, kind: input, shape index: {}]   ;;  %s414_s3 = inlined_call_operand.vmem [shape: f32[8,1], index: 3, kind: input, shape index: {}]   ;;  %s415_s4 = inlined_call_operand.vmem [shape: f32[2,8,256], index: 4, kind: input, shape index: {}]   ;;  %s416_s5 = inlined_call_operand.vmem [shape: f32[2,8,256], index: 5, kind: output, shape index: {}]  }
   0x1 LB: > { %s318_s19 = sadd.s32 4294967295, %s349_s18   ;;  %p322_p0 = scmp.ge.s32.totalorder %s349_s18, 1  ;;  %s349_s18 = sphi %s382_s18, %s15_s18  }
   0x2   : > { %p187_p1 = scmp.lt.s32.totalorder %s349_s18, 3 }
   0x4   : > { %p188_p2 = pnand %p322_p0, %p187_p1 }
   0x5   : > { %v225_v0 = vld [vmem:[%s411_s0] sm:$0xff] (!%p188_p2)  ;;  %v351_v2 = vmov (!%p188_p2), 0   ;;  %p215_p3 = scmp.lt.s32.totalorder (!%p188_p2), %s318_s19, 1 }
   0x6   : > { %191 = sbr.rel (%p188_p2) target bundleno = 167 (0xa7), region = 40  ;;  %v227_v1 = vld [vmem:[%s412_s1] sm:$0xff] (!%p188_p2)  ;;  %340 = vset.pattern.permute.xlu0 (!%p188_p2), %v351_v2  ;;  %v226_v3 = vmul.f32 (!%p188_p2), 0.0025510204, %v225_v0 }
   0x7   : > { %v228_v4 = vmul.f32 (!%p188_p2), 0.0025510204, %v227_v1  ;;  %v232_v9 = vld [vmem:[%s413_s2] sm:$0xff] (!%p188_p2) }
   0x8   : > { %v229_v5 = vmul.f32 (!%p188_p2), %v226_v3, %v226_v3  ;;  %v236_v12 = vld [vmem:[%s414_s3] sm:$0xff] (!%p188_p2) }
   0xa   : > { %v230_v6 = vsub.f32 (!%p188_p2), %v228_v4, %v229_v5 }
   0xc   : > { %v231_v7 = vmax.f32 (!%p188_p2), %v230_v6, 0.0 }
   0xd   : > { %s418_s19 = smov (!%p215_p3, %s318_s19), 1 }
   0xe   : > { %v233_v8 = vadd.f32 1e-05, %v231_v7  ;;  %s329_s28 = sshll.u32 %s418_s19, 4 }
   0xf   : > { %s219_s6 = scalar_lea.vmem %s415_s4, %s329_s28  ;;  %s224_s9 = scalar_lea.vmem %s416_s5, %s329_s28 }
  0x10   : > { %341 = vrsqrt.f32 %v233_v8  ;;  %v239_v16 = vld [vmem:[%s219_s6] sm:$0xff]  ;;  %v240_v17 = vld [vmem:[%s219_s6 + $0x8] sm:$0xff] }
  0x1a   : > { %v342_v10 = vpop.eup %341 }
  0x1b   : > { %v235_v11 = vmul.f32 %v342_v10, %v232_v9 }
  0x1d   : > { %243 = vperm.xlu0 %340, %v235_v11   ;;  %v237_v13 = vmul.f32 %v235_v11, %v226_v3 }
  0x1f   : > { %v238_v14 = vsub.f32 %v236_v12, %v237_v13 }
  0x21   : > { %250 = vperm.xlu0 %340, %v238_v14  }
  0x9c   : > { %v244_v15 = vpop.permute.xlu0 %243 }
  0x9d   : > { %v246_v18 = vmul.f32 %v244_v15, %v239_v16  ;;  %v247_v19 = vmul.f32 %v244_v15, %v240_v17 }
  0xa0   : > { %v251_v20 = vpop.permute.xlu0 %250 }
  0xa1   : > { %v253_v21 = vadd.f32 %v251_v20, %v246_v18  ;;  %v254_v22 = vadd.f32 %v251_v20, %v247_v19 }
  0xa3   : > { %vm255_vm0 = vcmp.ge.f32.partialorder %v253_v21, 0.0  ;;  %vm256_vm1 = vcmp.ge.f32.partialorder %v254_v22, 0.0  ;;  %v257_v23 = vmul.f32 0.01, %v253_v21  ;;  %v258_v24 = vmul.f32 0.01, %v254_v22 }
  0xa5   : > { %v259_v25 = vsel %vm255_vm0, %v253_v21, %v257_v23  ;;  %v260_v26 = vsel %vm256_vm1, %v254_v22, %v258_v24 }
  0xa6   : > { %261 = vst [vmem:[%s224_s9] sm:$0xff] %v259_v25  ;;  %262 = vst [vmem:[%s224_s9 + $0x8] sm:$0xff] %v260_v26 }
  0xa7 PF: > { %s15_s18 = sadd.s32 1, %s349_s18  }
  0xa8   : > { %p12_p4 = scmp.ge.s32.totalorder %s15_s18, 4  }
  0xaa   :  { %14 = sbr.rel (!%p12_p4) target bundleno = 1 (0x1), region = 70 }

// kernel: conv_block.2
= control target key start
LH: loop header
LB: loop body
LE: loop exit
PB: predicated region body
PF: predicated region fallthrough
CT: control target
= control target key end

     0   :  { %s1037_s18 = smov 0   ;;  %s1165_s0 = inlined_call_operand.vmem [shape: bf16[2,4,290], index: 0, kind: input, shape index: {}]   ;;  %s1166_s1 = inlined_call_operand.vmem [shape: bf16[9,8,4], index: 1, kind: input, shape index: {}]   ;;  %s1167_s2 = inlined_call_operand.vmem [shape: f32[1,256], index: 2, kind: input, shape index: {}]   ;;  %s1168_s3 = inlined_call_operand.vmem [shape: f32[2,8,256], index: 3, kind: output, shape index: {0}]   ;;  %s1169_s4 = inlined_call_operand.vmem [shape: f32[8,1], index: 4, kind: output, shape index: {1}]   ;;  %s1170_s5 = inlined_call_operand.vmem [shape: f32[8,1], index: 5, kind: output, shape index: {2}]  }
   0x1 LB: > { %s1043_s19 = sadd.s32 4294967295, %s994_s18   ;;  %p903_p0 = scmp.ge.s32.totalorder %s994_s18, 1  ;;  %s994_s18 = sphi %s1037_s18, %s16_s18  }
   0x2   : > { %p182_p1 = scmp.lt.s32.totalorder %s994_s18, 3 }
   0x4   : > { %p183_p2 = pnand %p903_p0, %p182_p1 }
   0x5   : > { %p210_p3 = scmp.lt.s32.totalorder (!%p183_p2), %s1043_s19, 1  ;;  %v230_v0 = vlaneseq (!%p183_p2)  ;;  %v996_v1 = vmov (!%p183_p2), 1983009808   ;;  %v997_v6 = vmov (!%p183_p2), 0   ;;  %s998_s25 = smov (!%p183_p2), 111   ;;  %vm487_vm0 = vcmask (!%p183_p2), 908288  }
   0x6   : > { %186 = sbr.rel (%p183_p2) target bundleno = 566 (0x236), region = 32  ;;  %v228_v2 = vunpack.c.l.s4 (!%p183_p2), %v996_v1  ;;  %531 = vmatprep.mubr.bf16.mxu0 (!%p183_p2), %v997_v6  ;;  %294 = vmatprep.mubr.bf16.mxu1 (!%p183_p2), %v997_v6  ;;  %s999_s26 = smov (!%p183_p2), 127   ;;  %vm255_vm1 = vcmask (!%p183_p2), 1041408   ;;  %vm251_vm2 = vcmask (!%p183_p2), 31744   ;;  %v918_v19 = vld [vmem:[%s1166_s1 + $0x10] sm:$0xf] (!%p183_p2) }
   0x7   : > { %v1051_v3 = vshrl.u32 (!%p183_p2), %v230_v0, 7  ;;  %s1000_s27 = smov (!%p183_p2), 110   ;;  %s1001_s28 = smov (!%p183_p2), 96   ;;  %vm248_vm3 = vcmask (!%p183_p2), 1039360   ;;  %vm550_vm4 = vcmask (!%p183_p2), 900096   ;;  %vm613_vm5 = vcmask (!%p183_p2), 785408  }
   0x8   : > { %v229_v4 = vunpack.c.0.s8 (!%p183_p2), %v228_v2  ;;  %s1002_s29 = smov (!%p183_p2), 126   ;;  %s1003_s30 = smov (!%p183_p2), 95   ;;  %v907_v28 = vld [vmem:[%s1166_s1 + $0x4] sm:$0xf] (!%p183_p2)  ;;  %v921_v34 = vld [vmem:[%s1166_s1 + $0x14] sm:$0xf] (!%p183_p2) }
   0x9   : > { %s1004_s6 = smov (!%p183_p2), 112   ;;  %s1005_s7 = smov (!%p183_p2), 94   ;;  %vm361_vm6 = vcmask (!%p183_p2), 1031168   ;;  %v222_v43 = vld [vmem:[%s1166_s1] sm:$0xf] (!%p183_p2)  ;;  %vm676_vm7 = vcmask (!%p183_p2), 777216  }
   0xa   : > { %v232_v5 = vsub.s32 (!%p183_p2), %v229_v4, %v1051_v3  ;;  %v924_v48 = vld [vmem:[%s1166_s1 + $0x18] sm:$0xf] (!%p183_p2)  ;;  %vm424_vm8 = vcmask (!%p183_p2), 916480   ;;  %v912_v57 = vld [vmem:[%s1166_s1 + $0x8] sm:$0xf] (!%p183_p2)  ;;  %vm739_vm9 = vcmask (!%p183_p2), 769024  }
   0xb   : > { %v927_v62 = vld [vmem:[%s1166_s1 + $0x1c] sm:$0xf] (!%p183_p2)  ;;  %p933_p4 = scmp.ne.s32.totalorder (!%p183_p2), %s1043_s19, 0 }
   0xd   : > { %s1049_s20 = scalar_select %p210_p3, %s1043_s19, 1 }
   0xe   : > { %vm800_vm10 = vcmask (!%p933_p4), 7168  }
   0xf   : > { %s967_s21 = smul.u32 6, %s1049_s20 }
  0x11   : > { %s214_s24 = scalar_lea.vmem %s1165_s0, %s967_s21 }
  0x12   : > { %v221_v7 = vld [vmem:[%s214_s24] sm:$0x3f] }
  0x13   : > { %v1060_v8 = vrot.slane %v221_v7, %v232_v5  ;;  %v226_v9 = vcombine.high %v221_v7, %v221_v7  ;;  %v930_v7 = vld [vmem:[%s1166_s1 + $0x20] sm:$0xf] }
  0x15   : > { %481 = vrot.lane.b32.xlu0 %v1060_v8, %s998_s25  ;;  %v240_v10 = vrot.slane %v226_v9, %v232_v5  ;;  %v241_v11 = vcombine.high %v1060_v8, %v1060_v8  ;;  %v307_v30 = vsel %vm255_vm1, %v1060_v8, 0  ;;  %v915_v5 = vld [vmem:[%s1166_s1 + $0xc] sm:$0xf] }
  0x17   : > { %485 = vrot.lane.b32.xlu1 %v240_v10, %s998_s25 }
  0x19   : > { %483 = vrot.lane.b32.xlu0 %v241_v11, %s998_s25 }
  0x1b   : > { %242 = vrot.lane.b32.xlu1 %v1060_v8, %s999_s26 }
  0x1d   : > { %544 = vrot.lane.b32.xlu0 %v1060_v8, %s1000_s27 }
  0x1f   : > { %246 = vrot.lane.b32.xlu1 %v240_v10, %s999_s26 }
  0x21   : > { %244 = vrot.lane.b32.xlu0 %v241_v11, %s999_s26 }
  0x23   : > { %546 = vrot.lane.b32.xlu1 %v241_v11, %s1000_s27 }
  0x25   : > { %548 = vrot.lane.b32.xlu0 %v240_v10, %s1000_s27 }
  0x27   : > { %607 = vrot.lane.b32.xlu1 %v1060_v8, %s1001_s28 }
  0x29   : > { %609 = vrot.lane.b32.xlu0 %v241_v11, %s1001_s28 }
  0x2b   : > { %611 = vrot.lane.b32.xlu1 %v240_v10, %s1001_s28 }
  0x2d   : > { %355 = vrot.lane.b32.xlu0 %v1060_v8, %s1002_s29 }
  0x2f   : > { %357 = vrot.lane.b32.xlu1 %v241_v11, %s1002_s29 }
  0x31   : > { %359 = vrot.lane.b32.xlu0 %v240_v10, %s1002_s29  ;;  %s936_s29 = sshll.u32 %s1049_s20, 4 }
  0x33   : > { %670 = vrot.lane.b32.xlu1 %v1060_v8, %s1003_s30 }
  0x35   : > { %672 = vrot.lane.b32.xlu0 %v241_v11, %s1003_s30 }
  0x37   : > { %674 = vrot.lane.b32.xlu1 %v240_v10, %s1003_s30 }
  0x39   : > { %418 = vrot.lane.b32.xlu0 %v1060_v8, %s1004_s6 }
  0x3b   : > { %420 = vrot.lane.b32.xlu1 %v241_v11, %s1004_s6 }
  0x3d   : > { %422 = vrot.lane.b32.xlu0 %v240_v10, %s1004_s6 }
  0x3f   : > { %733 = vrot.lane.b32.xlu1 %v1060_v8, %s1005_s7 }
  0x41   : > { %735 = vrot.lane.b32.xlu0 %v241_v11, %s1005_s7 }
  0x43   : > { %737 = vrot.lane.b32.xlu1 %v240_v10, %s1005_s7  ;;  %s219_s7 = scalar_lea.vmem %s1168_s3, %s936_s29 }
  0x87   : > { %v482_v12 = vpop.permute.xlu0 %481 }
  0x89   : > { %v486_v13 = vpop.permute.xlu1 %485 }
  0x8b   : > { %v484_v14 = vpop.permute.xlu0 %483 }
  0x8c   : > { %v489_v15 = vsel %vm487_vm0, %v484_v14, %v486_v13  ;;  %v488_v16 = vsel %vm487_vm0, %v482_v12, %v484_v14 }
  0x8d   : > { %919 = vmatprep.subr.msk.bf16.mxu0 %vm255_vm1, %v489_v15  ;;  %v243_v17 = vpop.permute.xlu1 %242  ;;  %v494_v18 = vsel %vm255_vm1, %v488_v16, 0 }
  0x8e   : > { %500 = vmatpush1.bf16.msra.mxu0 %v494_v18 }
  0x8f   : > { %v545_v20 = vpop.permute.xlu0 %544 }
  0x91   : > { %920 = vmatmul.mubr.msk.bf16.vlgmr.msra.gmra.mrb[0].mxu0 %vm251_vm2, %v918_v19  ;;  %v247_v21 = vpop.permute.xlu1 %246 }
  0x92   : > { %594 = vmatprep.mubr.bf16.mxu0 %v997_v6 }
  0x93   : > { %v245_v22 = vpop.permute.xlu0 %244 }
  0x94   : > { %v250_v23 = vsel %vm248_vm3, %v245_v22, %v247_v21  ;;  %v249_v24 = vsel %vm248_vm3, %v243_v17, %v245_v22  ;;  %v1006_v17 = vmov (!%p933_p4), 0.0  }
  0x95   : > { %908 = vmatprep.subr.msk.bf16.mxu1 %vm255_vm1, %v250_v23  ;;  %v547_v25 = vpop.permute.xlu1 %546  ;;  %v257_v26 = vsel %vm255_vm1, %v249_v24, 0  ;;  %801 = vst.msk [vmem:[%s1169_s4] sm:$0xff] (!%p933_p4), %vm800_vm10, %v1006_v17  ;;  %802 = vst.msk [vmem:[%s1170_s5] sm:$0xff] (!%p933_p4), %vm800_vm10, %v1006_v17 }
  0x96   : > { %v551_v27 = vsel %vm550_vm4, %v545_v20, %v547_v25  ;;  %263 = vmatpush1.bf16.msra.mxu1 %v257_v26 }
  0x97   : > { %v549_v29 = vpop.permute.xlu0 %548  ;;  %910 = vmatprep.subr.msk.bf16.mxu1 %vm255_vm1, %v241_v11  ;;  %v557_v32 = vsel %vm255_vm1, %v551_v27, 0 }
  0x98   : > { %v552_v31 = vsel %vm550_vm4, %v547_v25, %v549_v29 }
  0x99   : > { %909 = vmatmul.mubr.msk.bf16.vlgmr.msra.gmra.mrb[0].mxu1 %vm251_vm2, %v907_v28  ;;  %922 = vmatprep.subr.msk.bf16.mxu0 %vm255_vm1, %v552_v31  ;;  %v608_v33 = vpop.permute.xlu1 %607 }
  0x9a   : > { %563 = vmatpush1.bf16.msra.mxu0 %v557_v32  ;;  %313 = vmatpush1.bf16.msra.mxu1 %v307_v30 }
  0x9b   : > { %v610_v35 = vpop.permute.xlu0 %609  ;;  %344 = vmatprep.mubr.bf16.mxu1 %v997_v6 }
  0x9c   : > { %v614_v36 = vsel %vm613_vm5, %v608_v33, %v610_v35 }
  0x9d   : > { %923 = vmatmul.mubr.msk.bf16.vlgmr.msra.gmra.mrb[0].mxu0 %vm251_vm2, %v921_v34  ;;  %v620_v37 = vsel %vm255_vm1, %v614_v36, 0  ;;  %v612_v38 = vpop.permute.xlu1 %611 }
  0x9e   : > { %v615_v39 = vsel %vm613_vm5, %v610_v35, %v612_v38  ;;  %657 = vmatprep.mubr.bf16.mxu0 %v997_v6 }
  0x9f   : > { %925 = vmatprep.subr.msk.bf16.mxu0 %vm255_vm1, %v615_v39  ;;  %v356_v40 = vpop.permute.xlu0 %355 }
  0xa0   : > { %626 = vmatpush1.bf16.msra.mxu0 %v620_v37 }
  0xa1   : > { %v358_v41 = vpop.permute.xlu1 %357 }
  0xa2   : > { %v362_v42 = vsel %vm361_vm6, %v356_v40, %v358_v41 }
  0xa3   : > { %v368_v44 = vsel %vm255_vm1, %v362_v42, 0  ;;  %v360_v45 = vpop.permute.xlu0 %359 }
  0xa4   : > { %v363_v46 = vsel %vm361_vm6, %v358_v41, %v360_v45 }
  0xa5   : > { %911 = vmatmul.mubr.msk.bf16.vlgmr.msra.gmra.mrb[0].mxu1 %vm251_vm2, %v222_v43  ;;  %v671_v47 = vpop.permute.xlu1 %670  ;;  %913 = vmatprep.subr.msk.bf16.mxu1 %vm255_vm1, %v363_v46 }
  0xa6   : > { %374 = vmatpush1.bf16.msra.mxu1 %v368_v44  ;;  %405 = vmatprep.mubr.bf16.mxu1 %v997_v6 }
  0xa7   : > { %v673_v49 = vpop.permute.xlu0 %672 }
  0xa8   : > { %v677_v50 = vsel %vm676_vm7, %v671_v47, %v673_v49 }
  0xa9   : > { %926 = vmatmul.mubr.msk.bf16.vlgmr.msra.gmra.mrb[0].mxu0 %vm251_vm2, %v924_v48  ;;  %v683_v51 = vsel %vm255_vm1, %v677_v50, 0  ;;  %v675_v52 = vpop.permute.xlu1 %674 }
  0xaa   : > { %v678_v53 = vsel %vm676_vm7, %v673_v49, %v675_v52  ;;  %720 = vmatprep.mubr.bf16.mxu0 %v997_v6 }
  0xab   : > { %928 = vmatprep.subr.msk.bf16.mxu0 %vm255_vm1, %v678_v53  ;;  %v419_v54 = vpop.permute.xlu0 %418 }
  0xac   : > { %689 = vmatpush1.bf16.msra.mxu0 %v683_v51 }
  0xad   : > { %v421_v55 = vpop.permute.xlu1 %420 }
  0xae   : > { %v425_v56 = vsel %vm424_vm8, %v419_v54, %v421_v55 }
  0xaf   : > { %v431_v58 = vsel %vm255_vm1, %v425_v56, 0  ;;  %v423_v59 = vpop.permute.xlu0 %422 }
  0xb0   : > { %v426_v60 = vsel %vm424_vm8, %v421_v55, %v423_v59 }
  0xb1   : > { %914 = vmatmul.mubr.msk.bf16.vlgmr.msra.gmra.mrb[0].mxu1 %vm251_vm2, %v912_v57  ;;  %v734_v61 = vpop.permute.xlu1 %733  ;;  %916 = vmatprep.subr.msk.bf16.mxu1 %vm255_vm1, %v426_v60 }
  0xb2   : > { %437 = vmatpush1.bf16.msra.mxu1 %v431_v58  ;;  %468 = vmatprep.mubr.bf16.mxu1 %v997_v6 }
  0xb3   : > { %v736_v63 = vpop.permute.xlu0 %735 }
  0xb4   : > { %v740_v0 = vsel %vm739_vm9, %v734_v61, %v736_v63 }
  0xb5   : > { %929 = vmatmul.mubr.msk.bf16.vlgmr.msra.gmra.mrb[0].mxu0 %vm251_vm2, %v927_v62  ;;  %v746_v1 = vsel %vm255_vm1, %v740_v0, 0  ;;  %v738_v2 = vpop.permute.xlu1 %737 }
  0xb6   : > { %v741_v4 = vsel %vm739_vm9, %v736_v63, %v738_v2  ;;  %783 = vmatprep.mubr.bf16.mxu0 %v997_v6 }
  0xb7   : > { %931 = vmatprep.subr.msk.bf16.mxu0 %vm255_vm1, %v741_v4 }
  0xb8   : > { %752 = vmatpush1.bf16.msra.mxu0 %v746_v1 }
  0xbd   : > { %917 = vmatmul.mubr.msk.bf16.vlgmr.msra.gmra.mrb[0].mxu1 %vm251_vm2, %v915_v5 }
  0xc1   : > { %932 = vmatmul.mubr.msk.bf16.vlgmr.msra.gmra.mrb[0].mxu0 %vm251_vm2, %v930_v7 }
 0x190   : > { %v470_v8 = vpop.f32.mrb[0].mxu1 }
 0x191   : > { %v472_v9 = vpop.f32.mrb[1].mxu1 }
 0x192   : > { %v474_v10 = vpop.f32.mrb[2].mxu1  ;;  %799 = sbr.rel (%p933_p4) target bundleno = 409 (0x199), region = 36 }
 0x193   : > { %v475_v6 = vpop.f32.mrb[3].mxu1 }
 0x194   : > { %v785_v11 = vpop.f32.mrb[0].mxu0 }
 0x195   : > { %v937_v12 = vadd.f32 %v785_v11, %v470_v8  ;;  %v787_v13 = vpop.f32.mrb[1].mxu0 }
 0x196   : > { %v938_v14 = vadd.f32 %v787_v13, %v472_v9  ;;  %v789_v15 = vpop.f32.mrb[2].mxu0 }
 0x197   : > { %794 = vst [vmem:[%s219_s7] sm:$0xff] %v937_v12  ;;  %v790_v16 = vpop.f32.mrb[3].mxu0 }
 0x198   : > { %795 = vst [vmem:[%s219_s7 + $0x8] sm:$0xff] %v938_v14 }
 0x199 PF: > { %v803_v18 = vld [vmem:[%s1167_s2] sm:$0x3]  ;;  %v807_v19 = vsub.s32 0, %v1051_v3  ;;  %v811_v20 = vsub.s32 1, %v1051_v3  ;;  %vm822_vm11 = vcmask 7168  }
 0x19a   : > { %v817_v29 = vld [vmem:[%s1169_s4] sm:$0xff] }
 0x19b   : > { %v808_v21 = vrot.slane %v803_v18, %v807_v19  ;;  %v812_v22 = vrot.slane %v803_v18, %v811_v20  ;;  %v824_v3 = vld [vmem:[%s1170_s5] sm:$0xff] }
 0x19d   : > { %v815_v23 = vmul.f32 %v937_v12, %v808_v21  ;;  %v816_v24 = vmul.f32 %v938_v14, %v812_v22 }
 0x19f   : > { %v818_v25 = vadd.f32 %v816_v24, %v815_v23  ;;  %v825_v26 = vmul.f32 %v937_v12, %v815_v23  ;;  %v826_v27 = vmul.f32 %v938_v14, %v816_v24 }
 0x1a1   : > { %819 = vadd.xlane.f32.xlu0 %v818_v25  ;;  %v827_v28 = vadd.f32 %v826_v27, %v825_v26 }
 0x1a5   : > { %828 = vadd.xlane.f32.xlu0 %v827_v28 }
 0x22e   : > { %v820_v30 = vpop.xlane.xlu0 %819 }
 0x22f   : > { %v821_v31 = vadd.f32 %v820_v30, %v817_v29 }
 0x231   : > { %823 = vst.msk [vmem:[%s1169_s4] sm:$0xff] %vm822_vm11, %v821_v31 }
 0x232   : > { %v829_v32 = vpop.xlane.xlu0 %828 }
 0x233   : > { %v830_v33 = vadd.f32 %v829_v32, %v824_v3 }
 0x235   : > { %831 = vst.msk [vmem:[%s1170_s5] sm:$0xff] %vm822_vm11, %v830_v33 }
 0x236 PF: > { %s16_s18 = sadd.s32 1, %s994_s18  }
 0x237   : > { %p13_p5 = scmp.ge.s32.totalorder %s16_s18, 4  }
 0x239   :  { %15 = sbr.rel (!%p13_p5) target bundleno = 1 (0x1), region = 90 }

</bundles_post_ra>
